<compile_context>
chip_gen: v7x
topology: tpu7x:2x2x1
jax: 0.10.0
libtpu: 0.0.40
codegen_flags: <defaults>
</compile_context>

<pallas_src>
import functools

import jax
import jax.numpy as jnp
from jax.experimental import pallas as pl
from jax.experimental.pallas import tpu as pltpu

GAP_DAY = 5
KERNEL_SIZE = 360 // GAP_DAY            # 72 taps
DILATION = 5                            # stride is fixed to 1, as in the module
HALO = DILATION * (KERNEL_SIZE - 1)     # 355 extra input cols needed per output col
SCALE = 1.0 / KERNEL_SIZE               # every Conv1d weight is 1/72

HALO_BLK = 512                          # halo block width (>= HALO, multiple of 128)
TILE_L = 4096                           # default output tile width (multiple of HALO_BLK)
MAX_TILE_N = 32                         # cap on batch rows per block (multiple of 8)


def _round_up(x, m):
    return ((x + m - 1) // m) * m


def _dilated_sum(xw, out_w):
    """72-tap stride-5 moving sum via a log-doubling shift-add tree (7 adds).

    xw: (tn, W) float32 with W >= out_w + HALO.  Returns (tn, out_w) float32
    where result[:, t] = sum_{k=0..71} xw[:, t + 5k].
    """
    def shift_add(a, s):
        w = a.shape[1]
        return a[:, : w - s] + a[:, s:]

    s1 = shift_add(xw, 5)       # 2 taps
    s2 = shift_add(s1, 10)      # 4 taps
    s3 = shift_add(s2, 20)      # 8 taps  (span 35)
    s4 = shift_add(s3, 40)      # 16 taps
    s5 = shift_add(s4, 80)      # 32 taps
    s6 = shift_add(s5, 160)     # 64 taps (span 315)
    # 72 = 64 + 8: taps 64..71 are the 8-tap sum shifted by 64*5 = 320.
    return s6[:, :out_w] + s3[:, 320:320 + out_w]


def _conv_kernel_tiled(x_cur_ref, x_halo_ref, o_ref, *, tile_l):
    # x_cur: (tn, tile_l) current input window; x_halo: (tn, HALO_BLK) the next
    # HALO_BLK input columns (block index clamped in-bounds by the index_map;
    # any values only reachable from masked output columns are irrelevant).
    xw = jnp.concatenate([x_cur_ref[...], x_halo_ref[...]], axis=1)
    xw = xw.astype(jnp.float32)
    res = _dilated_sum(xw, tile_l) * jnp.float32(SCALE)
    o_ref[...] = res.astype(o_ref.dtype)


def _conv_kernel_single(x_ref, o_ref, *, l_out):
    # Whole (tn, L) row resident; produces all l_out = L - HALO outputs at once.
    xw = x_ref[...].astype(jnp.float32)
    res = _dilated_sum(xw, l_out) * jnp.float32(SCALE)
    o_ref[...] = res.astype(o_ref.dtype)


def _vmem_limit(block_bytes):
    # Explicit scoped-VMEM request: generous headroom over the double-buffered
    # blocks + in-kernel temporaries, kept well under v7x's 64 MiB physical.
    return int(min(48 * 2**20, max(32 * 2**20, 4 * block_bytes)))


def all_ones_conv(x, *, tile_l=TILE_L):
    """AllOnesConv forward pass.  x: (N, 1, L) -> (N, 1, L - 355)."""
    n, c, l = x.shape
    assert c == 1, "AllOnesConv has a single input channel"
    l_out = l - HALO
    assert l_out > 0, "input length must exceed dilation*(kernel_size-1) = 355"
    assert tile_l % HALO_BLK == 0 and tile_l >= HALO_BLK

    x2 = x.reshape(n, l)                       # free squeeze of the channel dim

    # Batch tiling: full batch when small, otherwise multiples of 8 rows.
    tile_n = n if n <= 8 else 8 * min(n // 8, MAX_TILE_N // 8)
    n_tiles = pl.cdiv(n, tile_n)

    out_shape = jax.ShapeDtypeStruct((n, l_out), x.dtype)
    flops = 9 * n * l_out                      # 8 adds + 1 mul per output

    if l_out < tile_l:
        # Single L-tile path: full-extent blocks, no halo input, no padding.
        block_bytes = 2 * 4 * tile_n * (l + l_out)
        out = pl.pallas_call(
            functools.partial(_conv_kernel_single, l_out=l_out),
            out_shape=out_shape,
            grid=(n_tiles,),
            in_specs=[pl.BlockSpec((tile_n, l), lambda i: (i, 0))],
            out_specs=pl.BlockSpec((tile_n, l_out), lambda i: (i, 0)),
            compiler_params=pltpu.CompilerParams(
                dimension_semantics=("parallel",),
                vmem_limit_bytes=_vmem_limit(block_bytes)),
            cost_estimate=pl.CostEstimate(
                flops=flops, transcendentals=0,
                bytes_accessed=int(4 * n * (l + l_out))),
        )(x2)
        return out.reshape(n, 1, l_out)

    # ---- Tiled path: l_out >= tile_l ------------------------------------
    # Balance the tile width so the last (boundary-masked) tile wastes little
    # work; keep it a multiple of HALO_BLK (halo block index math) and 128.
    l_tiles = pl.cdiv(l_out, tile_l)
    tile_l = min(tile_l, _round_up(pl.cdiv(l_out, l_tiles), HALO_BLK))
    l_tiles = pl.cdiv(l_out, tile_l)

    halo_ratio = tile_l // HALO_BLK
    last_halo = pl.cdiv(l, HALO_BLK) - 1       # last valid halo block index of x

    # Larger grid axis first so v7x core sharding of the leading parallel axis
    # has extent >= 2 even for a tiny batch.
    l_major = l_tiles >= n_tiles
    if l_major:
        grid = (l_tiles, n_tiles)
        cur_map = lambda j, i: (i, j)
        halo_map = lambda j, i: (i, jnp.minimum((j + 1) * halo_ratio, last_halo))
        out_map = lambda j, i: (i, j)
    else:
        grid = (n_tiles, l_tiles)
        cur_map = lambda i, j: (i, j)
        halo_map = lambda i, j: (i, jnp.minimum((j + 1) * halo_ratio, last_halo))
        out_map = lambda i, j: (i, j)

    block_bytes = 2 * 4 * tile_n * (2 * tile_l + HALO_BLK)
    out = pl.pallas_call(
        functools.partial(_conv_kernel_tiled, tile_l=tile_l),
        out_shape=out_shape,
        grid=grid,
        in_specs=[
            pl.BlockSpec((tile_n, tile_l), cur_map),      # current window of x
            pl.BlockSpec((tile_n, HALO_BLK), halo_map),   # halo: next 512 cols of x
        ],
        out_specs=pl.BlockSpec((tile_n, tile_l), out_map),
        compiler_params=pltpu.CompilerParams(
            dimension_semantics=("parallel", "parallel"),
            vmem_limit_bytes=_vmem_limit(block_bytes)),
        cost_estimate=pl.CostEstimate(
            flops=flops, transcendentals=0,
            bytes_accessed=int(4 * n * l * (1 + HALO_BLK / tile_l) + 4 * n * l_out)),
    )(x2, x2)                                   # same array via two block views
    return out.reshape(n, 1, l_out)


def _reference(x):
    n, _, l = x.shape
    l_out = l - HALO
    acc = jnp.zeros((n, l_out), jnp.float32)
    for k in range(KERNEL_SIZE):
        acc = acc + x[:, 0, k * DILATION:k * DILATION + l_out] * (1.0 / KERNEL_SIZE)
    return acc


if __name__ == "__main__":
    k1, k2, k3 = jax.random.split(jax.random.PRNGKey(0), 3)

    # Small shape: single-tile path (L_out = 45), full-extent blocks.
    x1 = jax.random.normal(k1, (2, 1, 400), dtype=jnp.float32)
    o1 = jax.block_until_ready(all_ones_conv(x1))
    assert o1.shape == (2, 1, 45)
    assert jnp.allclose(o1[:, 0, :], _reference(x1), atol=1e-5, rtol=1e-5)

    # Multi-tile path: ragged last L_out tile, halo blocks (incl. clamped last
    # halo), and a full-batch (non-multiple-of-8) N block.
    x2 = jax.random.normal(k2, (3, 1, 1500), dtype=jnp.float32)
    o2 = jax.block_until_ready(all_ones_conv(x2, tile_l=512))
    assert o2.shape == (3, 1, 1145)
    assert jnp.allclose(o2[:, 0, :], _reference(x2), atol=1e-5, rtol=1e-5)

    # Ragged batch: N=10 with 8-row blocks -> boundary-masked second row tile.
    x3 = jax.random.normal(k3, (10, 1, 400), dtype=jnp.float32)
    o3 = jax.block_until_ready(all_ones_conv(x3))
    assert o3.shape == (10, 1, 45)
    assert jnp.allclose(o3[:, 0, :], _reference(x3), atol=1e-5, rtol=1e-5)

    print("KERNEL_OK")
</pallas_src>

<mosaic_0001>
module attributes {stable_mosaic.version = 11 : i64} {
  func.func @_conv_kernel_single(%arg0: i32, %arg1: memref<2x400xf32, #tpu.memory_space<vmem>>, %arg2: memref<2x45xf32, #tpu.memory_space<vmem>>) attributes {dimension_semantics = [#tpu.dimension_semantics<parallel>], iteration_bounds = array<i64: 1>, scalar_prefetch = 0 : i64, scratch_operands = 0 : i64, tpu.core_type = #tpu.core_type<tc>, window_params = [{transform_indices = @transform_0, window_bounds = array<i64: 2, 400>}, {transform_indices = @transform_1, window_bounds = array<i64: 2, 45>}]} {
    %c0 = arith.constant 0 : index
    %c0_0 = arith.constant 0 : index
    %0 = vector.load %arg1[%c0, %c0_0] : memref<2x400xf32, #tpu.memory_space<vmem>>, vector<2x400xf32>
    %1 = vector.extract_strided_slice %0 {offsets = [0, 0], sizes = [2, 395], strides = [1, 1]} : vector<2x400xf32> to vector<2x395xf32>
    %2 = vector.extract_strided_slice %0 {offsets = [0, 5], sizes = [2, 395], strides = [1, 1]} : vector<2x400xf32> to vector<2x395xf32>
    %3 = arith.addf %1, %2 : vector<2x395xf32>
    %4 = vector.extract_strided_slice %3 {offsets = [0, 0], sizes = [2, 385], strides = [1, 1]} : vector<2x395xf32> to vector<2x385xf32>
    %5 = vector.extract_strided_slice %3 {offsets = [0, 10], sizes = [2, 385], strides = [1, 1]} : vector<2x395xf32> to vector<2x385xf32>
    %6 = arith.addf %4, %5 : vector<2x385xf32>
    %7 = vector.extract_strided_slice %6 {offsets = [0, 0], sizes = [2, 365], strides = [1, 1]} : vector<2x385xf32> to vector<2x365xf32>
    %8 = vector.extract_strided_slice %6 {offsets = [0, 20], sizes = [2, 365], strides = [1, 1]} : vector<2x385xf32> to vector<2x365xf32>
    %9 = arith.addf %7, %8 : vector<2x365xf32>
    %10 = vector.extract_strided_slice %9 {offsets = [0, 0], sizes = [2, 325], strides = [1, 1]} : vector<2x365xf32> to vector<2x325xf32>
    %11 = vector.extract_strided_slice %9 {offsets = [0, 40], sizes = [2, 325], strides = [1, 1]} : vector<2x365xf32> to vector<2x325xf32>
    %12 = arith.addf %10, %11 : vector<2x325xf32>
    %13 = vector.extract_strided_slice %12 {offsets = [0, 0], sizes = [2, 245], strides = [1, 1]} : vector<2x325xf32> to vector<2x245xf32>
    %14 = vector.extract_strided_slice %12 {offsets = [0, 80], sizes = [2, 245], strides = [1, 1]} : vector<2x325xf32> to vector<2x245xf32>
    %15 = arith.addf %13, %14 : vector<2x245xf32>
    %16 = vector.extract_strided_slice %15 {offsets = [0, 0], sizes = [2, 85], strides = [1, 1]} : vector<2x245xf32> to vector<2x85xf32>
    %17 = vector.extract_strided_slice %15 {offsets = [0, 160], sizes = [2, 85], strides = [1, 1]} : vector<2x245xf32> to vector<2x85xf32>
    %18 = arith.addf %16, %17 : vector<2x85xf32>
    %19 = vector.extract_strided_slice %18 {offsets = [0, 0], sizes = [2, 45], strides = [1, 1]} : vector<2x85xf32> to vector<2x45xf32>
    %20 = vector.extract_strided_slice %9 {offsets = [0, 320], sizes = [2, 45], strides = [1, 1]} : vector<2x365xf32> to vector<2x45xf32>
    %21 = arith.addf %19, %20 : vector<2x45xf32>
    %cst = arith.constant 0.013888889 : f32
    %22 = vector.broadcast %cst : f32 to vector<2x45xf32>
    %23 = arith.mulf %21, %22 : vector<2x45xf32>
    %c0_1 = arith.constant 0 : index
    %c0_2 = arith.constant 0 : index
    %24 = vector.load %arg2[%c0_1, %c0_2] : memref<2x45xf32, #tpu.memory_space<vmem>>, vector<2x45xf32>
    tpu.vector_store %arg2[%c0_1, %c0_2], %23 {strides = array<i32>} : memref<2x45xf32, #tpu.memory_space<vmem>>, vector<2x45xf32>,
    return
  }
  func.func @transform_0(%arg0: i32) -> (i32, i32) {
    %c0_i32 = arith.constant 0 : i32
    %c0_i32_0 = arith.constant 0 : i32
    return %arg0, %c0_i32 : i32, i32
  }
  func.func @transform_1(%arg0: i32) -> (i32, i32) {
    %c0_i32 = arith.constant 0 : i32
    %c0_i32_0 = arith.constant 0 : i32
    return %arg0, %c0_i32 : i32, i32
  }
}

</mosaic_0001>

<bundles_post_ra>
// kernel: tpu_custom_call.1
= control target key start
LH: loop header
LB: loop body
LE: loop exit
PB: predicated region body
PF: predicated region fallthrough
CT: control target
= control target key end

     0   :  { %6 = vsyncpa [#allocation3], 0  ;;  %s191_s0 = inlined_call_operand.hbm [shape: f32[2,400], index: 0, kind: input, shape index: {}]   ;;  %s192_s1 = inlined_call_operand.hbm [shape: f32[2,45], index: 1, kind: output, shape index: {}]  }
   0x1   :  { %7 = vsyncpa [#allocation4], 0  ;;  %s148_s6 = smov [#allocation2]   ;;  %s100_s10 = scalar_lea.hbm %s191_s0, 128 }
   0x2   :  { %s14_s7 = sshll.u32 %s148_s6, 4  ;;  %p101_p0 = scmp.ne.s32.totalorder %s191_s0, %s100_s10  ;;  %s15_s7 = int_to_ptr.vmem [resolvable:$true] %s14_s7 }
   0x3   :  { %p104_p1 = scmp.lt.u32.totalorder %s100_s10, %s191_s0 }
   0x5   :  { %p106_p2 = pnand %p104_p1, %p101_p0 }
   0x7   :  { %109 = shalt.err (!%p106_p2)
}
   0x8   :  { %s110_s15 = scalar_lea.vmem %s15_s7, 128  ;;  %p115_p4 = scmp.lt.s32.totalorder %s15_s7, %s15_s7 }
   0x9   :  { %p111_p3 = scmp.ne.s32.totalorder %s15_s7, %s110_s15  ;;  %p116_p5 = scmp.lt.s32.totalorder %s110_s15, %s110_s15 }
   0xb   :  { %p117_p6 = por %p116_p5, %p115_p4 }
   0xd   :  { %p118_p7 = pnand %p117_p6, %p111_p3 }
   0xf   :  { %121 = shalt.err (!%p118_p7)
}
  0x10   :  { %17 = dma.hbm_to_vmem [thread:$0]  %s191_s0, 128, %s15_s7, [#allocation3]  }
  0x11   :  { %144 = dma.done.wait [#allocation3], 128  }
  0x12   :  { %145 = vsyncadd [#allocation3], 4294967168  ;;  %v21_v0 = vld [vmem:[#allocation2] sm:$0xff]  ;;  %s149_s18 = smov 123   ;;  %vm26_vm0 = vcmask 1006592   ;;  %s150_s19 = smov 118  }
  0x13   :  { %23 = vrot.lane.b32.xlu0 %v21_v0, %s149_s18  ;;  %vm34_vm1 = vcmask 965632   ;;  %s151_s20 = smov 108   ;;  %vm42_vm2 = vcmask 883712   ;;  %s152_s0 = smov 88   ;;  %vm50_vm3 = vcmask 719872   ;;  %vm58_vm4 = vcmask 392192  }
  0x14   :  { %s153_s21 = smov 48   ;;  %s154_s22 = smov 64   ;;  %vm74_vm5 = vcmask 361472  }
  0x15   :  { %s155_s23 = smov 96   ;;  %s156_s24 = smov [#allocation5]  }
  0x16   :  { %s82_s25 = sshll.u32 %s156_s24, 4  ;;  %s83_s25 = int_to_ptr.vmem [resolvable:$true] %s82_s25 }
  0x17   :  { %s122_s26 = scalar_lea.vmem %s83_s25, 32  ;;  %p127_p9 = scmp.lt.s32.totalorder %s83_s25, %s83_s25 }
  0x18   :  { %p123_p8 = scmp.ne.s32.totalorder %s83_s25, %s122_s26  ;;  %p128_p10 = scmp.lt.s32.totalorder %s122_s26, %s122_s26 }
  0x1a   :  { %p129_p11 = por %p128_p10, %p127_p9 }
  0x1c   :  { %p130_p12 = pnand %p129_p11, %p123_p8 }
  0x85   :  { %v24_v1 = vpop.permute.xlu0 %23 }
  0x86   :  { %v25_v2 = vrot.slane %v24_v1, 2 }
  0x88   :  { %v27_v3 = vsel %vm26_vm0, %v24_v1, %v25_v2 }
  0x89   :  { %v29_v4 = vadd.f32 %v27_v3, %v21_v0 }
  0x8b   :  { %31 = vrot.lane.b32.xlu0 %v29_v4, %s150_s19 }
  0xfd   :  { %v32_v5 = vpop.permute.xlu0 %31 }
  0xfe   :  { %v33_v6 = vrot.slane %v32_v5, 2 }
 0x100   :  { %v35_v7 = vsel %vm34_vm1, %v32_v5, %v33_v6 }
 0x101   :  { %v37_v8 = vadd.f32 %v35_v7, %v29_v4 }
 0x103   :  { %39 = vrot.lane.b32.xlu1 %v37_v8, %s151_s20 }
 0x175   :  { %v40_v9 = vpop.permute.xlu1 %39 }
 0x176   :  { %v41_v10 = vrot.slane %v40_v9, 2 }
 0x178   :  { %v43_v11 = vsel %vm42_vm2, %v40_v9, %v41_v10 }
 0x179   :  { %v45_v12 = vadd.f32 %v43_v11, %v37_v8 }
 0x17b   :  { %47 = vrot.lane.b32.xlu1 %v45_v12, %s152_s0 }
 0x1ed   :  { %v48_v13 = vpop.permute.xlu1 %47 }
 0x1ee   :  { %v49_v14 = vrot.slane %v48_v13, 2 }
 0x1f0   :  { %v51_v15 = vsel %vm50_vm3, %v48_v13, %v49_v14 }
 0x1f1   :  { %v53_v16 = vadd.f32 %v51_v15, %v45_v12 }
 0x1f3   :  { %55 = vrot.lane.b32.xlu0 %v53_v16, %s153_s21 }
 0x1f7   :  { %68 = vrot.lane.b32.xlu0 %v45_v12, %s154_s22 }
 0x265   :  { %v56_v17 = vpop.permute.xlu0 %55 }
 0x266   :  { %v57_v18 = vrot.slane %v56_v17, 2 }
 0x268   :  { %v59_v19 = vsel %vm58_vm4, %v56_v17, %v57_v18 }
 0x269   :  { %v61_v20 = vadd.f32 %v59_v19, %v53_v16  ;;  %v69_v21 = vpop.permute.xlu0 %68 }
 0x26a   :  { %v70_v24 = vrot.slane %v69_v21, 4 }
 0x26b   :  { %63 = vrot.lane.b32.xlu1 %v61_v20, %s155_s23 }
 0x2dd   :  { %v64_v22 = vpop.permute.xlu1 %63 }
 0x2de   :  { %v65_v23 = vrot.slane %v64_v22, 2 }
 0x2e0   :  { %v67_v25 = vadd.f32 %v65_v23, %v61_v20 }
 0x2e2   :  { %v72_v26 = vadd.f32 %v70_v24, %v67_v25 }
 0x2e4   :  { %v73_v27 = vmul.f32 0.013888889, %v72_v26 }
 0x2e6   :  { %75 = vst.msk [vmem:[#allocation5] sm:$0x3] %vm74_vm5, %v73_v27 }
 0x2e7   :  { %133 = shalt.err (!%p130_p12)
}
 0x2e8   :  { %s134_s29 = scalar_lea.hbm %s192_s1, 32 }
 0x2e9   :  { %p135_p13 = scmp.ne.s32.totalorder %s192_s1, %s134_s29  ;;  %p138_p0 = scmp.lt.u32.totalorder %s134_s29, %s192_s1 }
 0x2eb   :  { %p140_p1 = pnand %p138_p0, %p135_p13 }
 0x2ed   :  { %143 = shalt.err (!%p140_p1)
}
 0x2ee   :  { %85 = dma.vmem_to_hbm [thread:$0]  %s83_s25, 32, %s192_s1, [#allocation4]  }
 0x2ef   :  { %146 = dma.done.wait [#allocation4], 32  }
 0x2f0   :  { %147 = vsyncadd [#allocation4], 4294967264 }
 0x2f1   :  { %89 = vsyncpa [#allocation3], 1 }
 0x2f2   :  { %90 = vsyncpa [#allocation4], 1 }

</bundles_post_ra>
